<compile_context>
chip_gen: v7x
topology: tpu7x:2x2x1
jax: 0.10.0
libtpu: 0.0.40
codegen_flags: <defaults>
</compile_context>

<pallas_src>
import functools

import jax
import jax.numpy as jnp
from jax import lax
from jax.experimental import pallas as pl
from jax.experimental.pallas import tpu as pltpu


def _round_up(x, m):
    return ((x + m - 1) // m) * m


def _pick_tile_m(M, desired):
    """Pick the row (pixel) tile size.

    Large tiles (~512) get close to the HBM roofline; capping at ~M/2 keeps at
    least two grid steps so both v7x TensorCores receive work on small inputs.
    """
    if M <= 16:
        return M                           # single full block ("equal to dim" is legal)
    half = _round_up((M + 1) // 2, 8)      # aim for >= 2 grid steps
    tm = min(desired, half)
    tm = max(8, (tm // 8) * 8)             # second-minor block dim must be a multiple of 8
    return tm


# ----------------------------------------------------------------------------
# Pallas kernel: rows-of-pixels @ resident projection weight + bias (1x1 conv)
# ----------------------------------------------------------------------------
def _proj_kernel(x_ref, w_ref, b_ref, o_ref, *, precision):
    # x_ref: (tile_m, C) activation tile   w_ref: (C, E) resident weight
    # b_ref: (1, E) f32 bias               o_ref: (tile_m, E) output tile
    acc = jnp.dot(x_ref[...], w_ref[...],
                  preferred_element_type=jnp.float32,
                  precision=precision)
    o_ref[...] = (acc + b_ref[...]).astype(o_ref.dtype)


def hybrid_embed_proj(x_flat, w2d, bias, *, tile_m=512, out_dtype=None,
                      precision=None):
    """x_flat: (M, C), w2d: (C, E), bias: (E,) -> (M, E) = x_flat @ w2d + bias."""
    M, C = x_flat.shape
    Cw, E = w2d.shape
    assert C == Cw, (C, Cw)
    out_dtype = x_flat.dtype if out_dtype is None else out_dtype

    tile_m = _pick_tile_m(M, tile_m)
    grid_m = pl.cdiv(M, tile_m)

    b2d = bias.astype(jnp.float32).reshape(1, E)

    # VMEM budget: double-buffered x / out tiles + resident weight + bias,
    # 1.5x headroom, capped at 48 MiB (leaves headroom on v7x's 64 MiB).
    x_it = jnp.dtype(x_flat.dtype).itemsize
    w_it = jnp.dtype(w2d.dtype).itemsize
    o_it = jnp.dtype(out_dtype).itemsize
    est = (2 * tile_m * C * x_it        # double-buffered activation tile
           + 2 * C * E * w_it           # weight (resident, buffers still allocated)
           + 2 * E * 4                  # bias (f32)
           + 2 * tile_m * E * o_it)     # double-buffered output tile
    vmem_limit = int(min(max(int(est * 1.5), 8 << 20), 48 << 20))

    kernel = functools.partial(_proj_kernel, precision=precision)

    return pl.pallas_call(
        kernel,
        out_shape=jax.ShapeDtypeStruct((M, E), out_dtype),
        grid_spec=pltpu.PrefetchScalarGridSpec(
            num_scalar_prefetch=0,
            grid=(grid_m,),
            in_specs=[
                pl.BlockSpec((tile_m, C), lambda i: (i, 0)),   # activations stream
                pl.BlockSpec((C, E), lambda i: (0, 0)),        # weight stays resident
                pl.BlockSpec((1, E), lambda i: (0, 0)),        # bias stays resident
            ],
            out_specs=pl.BlockSpec((tile_m, E), lambda i: (i, 0)),
        ),
        compiler_params=pltpu.CompilerParams(
            dimension_semantics=("parallel",),
            vmem_limit_bytes=vmem_limit,
        ),
    )(x_flat, w2d, b2d)


# ----------------------------------------------------------------------------
# Glue: synthetic deterministic backbone + HybridEmbed.forward
# ----------------------------------------------------------------------------
def make_params(key, in_chans, feat_dim, embed_dim):
    k1, k2, k3 = jax.random.split(key, 3)
    # TODO(synk): the real HybridEmbed wraps an arbitrary nn.Module backbone; this
    # deterministic 3x3 stride-2 conv + ReLU only models its (B,C,H,W)->(B,Cf,Hf,Wf)
    # shape contract.
    bb_w = jax.random.normal(k1, (feat_dim, in_chans, 3, 3), jnp.float32) * 0.1     # OIHW
    # self.proj = nn.Conv2d(feature_dim, embed_dim, 1)
    proj_w = jax.random.normal(k2, (embed_dim, feat_dim, 1, 1), jnp.float32) * 0.1
    proj_b = jax.random.normal(k3, (embed_dim,), jnp.float32) * 0.1
    return dict(bb_w=bb_w, proj_w=proj_w, proj_b=proj_b)


def backbone_forward_nhwc(x_nhwc, bb_w_oihw):
    # Channels-last conv: the (large) feature map is produced NHWC and already
    # in the compute dtype -> no extra HBM transpose / cast passes before the
    # memory-bound projection kernel.
    w_hwio = jnp.transpose(bb_w_oihw, (2, 3, 1, 0)).astype(x_nhwc.dtype)
    y = lax.conv_general_dilated(
        x_nhwc, w_hwio,
        window_strides=(2, 2),
        padding=((1, 1), (1, 1)),
        dimension_numbers=("NHWC", "HWIO", "NHWC"),
    )
    return jnp.maximum(y, 0.0)


def hybrid_embed_forward(x_nchw, params, *, compute_dtype=jnp.bfloat16,
                         out_dtype=None, tile_m=512):
    # x = self.backbone(x): only the small raw image is transposed/cast.
    x_nhwc = jnp.transpose(x_nchw, (0, 2, 3, 1)).astype(compute_dtype)
    f = backbone_forward_nhwc(x_nhwc, params["bb_w"])         # (B, Hf, Wf, Cf)
    B, Hf, Wf, Cf = f.shape
    x_flat = f.reshape(B * Hf * Wf, Cf)                       # rows = pixels, channels last

    # 1x1 conv weight (E, Cf, 1, 1) -> (Cf, E)
    w2d = jnp.transpose(params["proj_w"][:, :, 0, 0], (1, 0)).astype(compute_dtype)
    E = w2d.shape[1]

    precision = lax.Precision.HIGHEST if compute_dtype == jnp.float32 else None
    out_dtype = compute_dtype if out_dtype is None else out_dtype

    # x = self.proj(x).flatten(2).transpose(1, 2)  -> Pallas hot path
    out = hybrid_embed_proj(x_flat, w2d, params["proj_b"],
                            tile_m=tile_m, out_dtype=out_dtype,
                            precision=precision)              # (B*Hf*Wf, E)
    return out.reshape(B, Hf * Wf, E)                         # (B, num_patches, embed_dim)


if __name__ == "__main__":
    key = jax.random.PRNGKey(0)
    kx, kp = jax.random.split(key)

    # small shapes: batch=2, in_chans=4, img_size=16, feature_dim=16, embed_dim=32
    B, Cin, H, W = 2, 4, 16, 16
    feat_dim, embed_dim = 16, 32

    x = jax.random.normal(kx, (B, Cin, H, W), jnp.float32)    # NCHW, like PyTorch
    params = make_params(kp, Cin, feat_dim, embed_dim)

    # pure-JAX reference of the full forward (HIGHEST precision on both sides)
    f_ref = backbone_forward_nhwc(jnp.transpose(x, (0, 2, 3, 1)), params["bb_w"])
    ref = (jnp.einsum("bhwc,ec->bhwe", f_ref, params["proj_w"][:, :, 0, 0],
                      precision=lax.Precision.HIGHEST)
           + params["proj_b"]).reshape(B, -1, embed_dim)

    # f32 path (precision=HIGHEST on the MXU) — tight check
    out_f32 = hybrid_embed_forward(x, params, compute_dtype=jnp.float32,
                                   out_dtype=jnp.float32)
    out_f32 = jax.block_until_ready(out_f32)
    assert out_f32.shape == (B, (H // 2) * (W // 2), embed_dim), out_f32.shape
    assert jnp.allclose(out_f32, ref, atol=1e-4, rtol=1e-4), "f32 mismatch vs reference"

    # bf16 path (production default: bf16 feature map + bf16 output writes) — loose check
    out_bf16 = hybrid_embed_forward(x, params, compute_dtype=jnp.bfloat16)
    out_bf16 = jax.block_until_ready(out_bf16)
    assert out_bf16.shape == (B, (H // 2) * (W // 2), embed_dim), out_bf16.shape
    assert out_bf16.dtype == jnp.bfloat16, out_bf16.dtype
    assert jnp.allclose(out_bf16.astype(jnp.float32), ref, atol=5e-2, rtol=5e-2), \
        "bf16 mismatch vs reference"

    print("KERNEL_OK")
</pallas_src>

<mosaic_0001>
module attributes {stable_mosaic.version = 11 : i64} {
  func.func @_proj_kernel(%arg0: i32, %arg1: memref<64x16xf32, #tpu.memory_space<vmem>>, %arg2: memref<16x32xf32, #tpu.memory_space<vmem>>, %arg3: memref<1x32xf32, #tpu.memory_space<vmem>>, %arg4: memref<64x32xf32, #tpu.memory_space<vmem>>) attributes {dimension_semantics = [#tpu.dimension_semantics<parallel>], iteration_bounds = array<i64: 2>, scalar_prefetch = 0 : i64, scratch_operands = 0 : i64, tpu.core_type = #tpu.core_type<tc>, window_params = [{transform_indices = @transform_0, window_bounds = array<i64: 64, 16>}, {pipeline_mode = #tpu.pipeline_mode<synchronous>, transform_indices = @transform_1, window_bounds = array<i64: 16, 32>}, {pipeline_mode = #tpu.pipeline_mode<synchronous>, transform_indices = @transform_2, window_bounds = array<i64: 1, 32>}, {transform_indices = @transform_3, window_bounds = array<i64: 64, 32>}]} {
    %c0 = arith.constant 0 : index
    %c0_0 = arith.constant 0 : index
    %0 = vector.load %arg1[%c0, %c0_0] : memref<64x16xf32, #tpu.memory_space<vmem>>, vector<64x16xf32>
    %c0_1 = arith.constant 0 : index
    %c0_2 = arith.constant 0 : index
    %1 = vector.load %arg2[%c0_1, %c0_2] : memref<16x32xf32, #tpu.memory_space<vmem>>, vector<16x32xf32>
    %cst = arith.constant dense<0.000000e+00> : vector<64x32xf32>
    %2 = tpu.matmul %0, %1, %cst {dimension_numbers = #tpu.dot_dimension_numbers<[1], [0], [0], [1], [0, 0, 1, 1], [], []>, precision = #tpu.contract_precision<fp32>} : vector<64x16xf32>, vector<16x32xf32>, vector<64x32xf32> -> vector<64x32xf32>
    %c0_3 = arith.constant 0 : index
    %c0_4 = arith.constant 0 : index
    %3 = vector.load %arg3[%c0_3, %c0_4] : memref<1x32xf32, #tpu.memory_space<vmem>>, vector<1x32xf32>
    %4 = vector.broadcast %3 : vector<1x32xf32> to vector<64x32xf32>
    %5 = arith.addf %2, %4 : vector<64x32xf32>
    %c0_5 = arith.constant 0 : index
    %c0_6 = arith.constant 0 : index
    %6 = vector.load %arg4[%c0_5, %c0_6] : memref<64x32xf32, #tpu.memory_space<vmem>>, vector<64x32xf32>
    tpu.vector_store %arg4[%c0_5, %c0_6], %5 {strides = array<i32>} : memref<64x32xf32, #tpu.memory_space<vmem>>, vector<64x32xf32>,
    return
  }
  func.func @transform_0(%arg0: i32) -> (i32, i32) {
    %c0_i32 = arith.constant 0 : i32
    %c0_i32_0 = arith.constant 0 : i32
    return %arg0, %c0_i32 : i32, i32
  }
  func.func @transform_1(%arg0: i32) -> (i32, i32) {
    %c0_i32 = arith.constant 0 : i32
    %c0_i32_0 = arith.constant 0 : i32
    %c0_i32_1 = arith.constant 0 : i32
    return %c0_i32, %c0_i32_0 : i32, i32
  }
  func.func @transform_2(%arg0: i32) -> (i32, i32) {
    %c0_i32 = arith.constant 0 : i32
    %c0_i32_0 = arith.constant 0 : i32
    %c0_i32_1 = arith.constant 0 : i32
    return %c0_i32, %c0_i32_0 : i32, i32
  }
  func.func @transform_3(%arg0: i32) -> (i32, i32) {
    %c0_i32 = arith.constant 0 : i32
    %c0_i32_0 = arith.constant 0 : i32
    return %arg0, %c0_i32 : i32, i32
  }
}

</mosaic_0001>

<bundles_post_ra>
// kernel: tpu_custom_call.1
= control target key start
LH: loop header
LB: loop body
LE: loop exit
PB: predicated region body
PF: predicated region fallthrough
CT: control target
= control target key end

     0   :  { %s1317_s12 = smov 0   ;;  %s1477_s0 = inlined_call_operand.vmem [shape: f32[128,16], index: 0, kind: input, shape index: {}]   ;;  %s1478_s1 = inlined_call_operand.vmem [shape: f32[16,32], index: 1, kind: input, shape index: {}]   ;;  %s1479_s2 = inlined_call_operand.vmem [shape: f32[1,32], index: 2, kind: input, shape index: {}]   ;;  %s1480_s3 = inlined_call_operand.vmem [shape: f32[128,32], index: 3, kind: output, shape index: {}]  }
   0x1 LB: > { %s1041_s13 = sadd.s32 4294967295, %s1295_s12   ;;  %p1045_p0 = scmp.ge.s32.totalorder %s1295_s12, 1  ;;  %s1295_s12 = sphi %s1317_s12, %s13_s12  }
   0x2   : > { %p138_p1 = scmp.lt.s32.totalorder %s1295_s12, 3 }
   0x4   : > { %p139_p2 = pnand %p1045_p0, %p138_p1 }
   0x5   : > { %v182_v0 = vld [vmem:[%s1478_s1] sm:$0xff] (!%p139_p2)  ;;  %v183_v1 = vld [vmem:[%s1478_s1 + $0x8] sm:$0xff] (!%p139_p2)  ;;  %s1046_s18 = sshll.u32 (!%p139_p2), %s1041_s13, 3  ;;  %vm191_vm0 = vcmask (!%p139_p2), 130048   ;;  %vm976_vm1 = vcmask (!%p139_p2), 261120  }
   0x6   : > { %142 = sbr.rel (%p139_p2) target bundleno = 291 (0x123), region = 32  ;;  %v217_v2 = vand.u32 (!%p139_p2), 4294901760, %v182_v0  ;;  %v220_v3 = vand.u32 (!%p139_p2), 4294901760, %v183_v1  ;;  %p163_p3 = scmp.lt.s32.totalorder (!%p139_p2), %s1046_s18, 15 }
   0x8   : > { %v1331_v4 = vpack.c.bf16 (!%p139_p2), %v220_v3, %v217_v2  ;;  %v1335_v5 = vsub.f32 (!%p139_p2), %v182_v0, %v217_v2  ;;  %v1337_v6 = vsub.f32 (!%p139_p2), %v183_v1, %v220_v3 }
   0xa   : > { %1222 = vmatprep.subr.bf16.mxu0 (!%p139_p2), %v1331_v4  ;;  %1210 = vmatprep.subr.bf16.mxu1 (!%p139_p2), %v1331_v4  ;;  %v366_v7 = vand.u32 (!%p139_p2), 4294901760, %v1335_v5  ;;  %v373_v8 = vand.u32 (!%p139_p2), 4294901760, %v1337_v6  ;;  %v1217_v62 = vpack.c.bf16 (!%p139_p2), %v1337_v6, %v1335_v5 }
   0xb   : > { %1224 = vmatpush3.bf16.msra.mxu0 (!%p139_p2), %v1331_v4  ;;  %1212 = vmatpush3.bf16.msra.mxu1 (!%p139_p2), %v1331_v4 }
   0xc   : > { %v367_v11 = vsub.f32 (!%p139_p2), %v1335_v5, %v366_v7  ;;  %v374_v12 = vsub.f32 (!%p139_p2), %v1337_v6, %v373_v8  ;;  %v1225_v14 = vpack.c.bf16 (!%p139_p2), %v373_v8, %v366_v7 }
   0xd   : > { %s1482_s18 = smov (!%p163_p3, %s1046_s18), 15 }
   0xe   : > { %s1047_s19 = sshll.u32 %s1482_s18, 3  ;;  %v368_v23 = vand.u32 4294901760, %v367_v11  ;;  %v375_v24 = vand.u32 4294901760, %v374_v12  ;;  %1226 = vmatprep.subr.bf16.mxu0 %v1225_v14 }
   0xf   : > { %s166_s22 = scalar_lea.vmem %s1477_s0, %s1047_s19  ;;  %s1456_s27 = scalar_lea.vmem %s1480_s3, %s1047_s19 }
  0x10   : > { %v174_v9 = vld [vmem:[%s166_s22] sm:$0xff]  ;;  %v175_v10 = vld [vmem:[%s166_s22 + $0x8] sm:$0xff]  ;;  %v176_v13 = vld [vmem:[%s166_s22 + $0x10] sm:$0xff]  ;;  %v1213_v32 = vpack.c.bf16 %v375_v24, %v368_v23 }
  0x11   : > { %v193_v15 = vsel %vm191_vm0, %v174_v9, 0  ;;  %v196_v16 = vsel %vm191_vm0, %v175_v10, 0  ;;  %v199_v17 = vsel %vm191_vm0, %v176_v13, 0  ;;  %v177_v18 = vld [vmem:[%s166_s22 + $0x18] sm:$0xff]  ;;  %v178_v19 = vld [vmem:[%s166_s22 + $0x20] sm:$0xff]  ;;  %v179_v20 = vld [vmem:[%s166_s22 + $0x28] sm:$0xff] }
  0x12   : > { %v1356_v21 = vand.u32 4294901760, %v193_v15  ;;  %v1358_v22 = vand.u32 4294901760, %v196_v16  ;;  %v180_v25 = vld [vmem:[%s166_s22 + $0x30] sm:$0xff]  ;;  %v1360_v26 = vand.u32 4294901760, %v199_v17  ;;  %v202_v27 = vsel %vm191_vm0, %v177_v18, 0  ;;  %v181_v34 = vld [vmem:[%s166_s22 + $0x38] sm:$0xff]  ;;  %1214 = vmatprep.subr.bf16.mxu1 %v1213_v32 }
  0x13   : > { %v205_v28 = vsel %vm191_vm0, %v178_v19, 0  ;;  %v208_v29 = vsel %vm191_vm0, %v179_v20, 0  ;;  %v1371_v33 = vand.u32 4294901760, %v202_v27  ;;  %v211_v38 = vsel %vm191_vm0, %v180_v25, 0  ;;  %v1050_v10 = vld [vmem:[%s1479_s2] ss:$0 sm:$0xff] }
  0x14   : > { %v1366_v30 = vsub.f32 %v193_v15, %v1356_v21  ;;  %v1369_v31 = vsub.f32 %v196_v16, %v1358_v22  ;;  %v1374_v35 = vsub.f32 %v199_v17, %v1360_v26  ;;  %v1376_v36 = vand.u32 4294901760, %v205_v28 }
  0x15   : > { %v1378_v37 = vand.u32 4294901760, %v208_v29  ;;  %v1384_v41 = vsub.f32 %v202_v27, %v1371_v33  ;;  %v1386_v42 = vand.u32 4294901760, %v211_v38  ;;  %v214_v46 = vsel %vm191_vm0, %v181_v34, 0 }
  0x16   : > { %v285_v39 = vand.u32 4294901760, %v1366_v30  ;;  %v295_v40 = vand.u32 4294901760, %v1369_v31  ;;  %v305_v43 = vand.u32 4294901760, %v1374_v35  ;;  %v1390_v44 = vsub.f32 %v205_v28, %v1376_v36 }
  0x17   : > { %v1393_v45 = vsub.f32 %v208_v29, %v1378_v37  ;;  %v315_v49 = vand.u32 4294901760, %v1384_v41  ;;  %v1400_v50 = vsub.f32 %v211_v38, %v1386_v42  ;;  %v1405_v54 = vand.u32 4294901760, %v214_v46 }
  0x18   : > { %1165 = vmatprep.mubr.f32.mxu0 %v285_v39  ;;  %v286_v47 = vsub.f32 %v1366_v30, %v285_v39  ;;  %v296_v48 = vsub.f32 %v1369_v31, %v295_v40  ;;  %v306_v51 = vsub.f32 %v1374_v35, %v305_v43  ;;  %v325_v52 = vand.u32 4294901760, %v1390_v44 }
  0x19   : > { %1166 = vmatmul.mubr.f32.vlgmr.msra.gmra.mrb[0].mxu0 %v295_v40  ;;  %v335_v53 = vand.u32 4294901760, %v1393_v45  ;;  %v316_v57 = vsub.f32 %v1384_v41, %v315_v49  ;;  %v345_v58 = vand.u32 4294901760, %v1400_v50  ;;  %v354_v61 = vsub.f32 %v214_v46, %v1405_v54 }
  0x1a   : > { %v287_v55 = vand.u32 4294901760, %v286_v47  ;;  %1168 = vmatprep.mubr.f32.mxu0 %v305_v43  ;;  %v297_v56 = vand.u32 4294901760, %v296_v48  ;;  %1228 = vmatpush3.bf16.msra.mxu0 %v1225_v14  ;;  %v307_v59 = vand.u32 4294901760, %v306_v51  ;;  %v326_v60 = vsub.f32 %v1390_v44, %v325_v52 }
  0x1b   : > { %1230 = vmatprep.subr.bf16.mxu0 %v1331_v4  ;;  %v317_v63 = vand.u32 4294901760, %v316_v57  ;;  %v336_v0 = vsub.f32 %v1393_v45, %v335_v53  ;;  %v355_v1 = vand.u32 4294901760, %v354_v61  ;;  %v346_v3 = vsub.f32 %v1400_v50, %v345_v58 }
  0x1c   : > { %1117 = vmatprep.mubr.f32.mxu1 %v287_v55  ;;  %v327_v2 = vand.u32 4294901760, %v326_v60 }
  0x1d   : > { %1118 = vmatmul.mubr.f32.vlgmr.msra.gmra.mrb[0].mxu1 %v297_v56  ;;  %1169 = vmatmul.mubr.f32.gmra.mrb[2].mxu0 %v315_v49  ;;  %v337_v7 = vand.u32 4294901760, %v336_v0  ;;  %v356_v5 = vsub.f32 %v354_v61, %v355_v1  ;;  %v347_v6 = vand.u32 4294901760, %v346_v3 }
  0x1e   : > { %1216 = vmatpush3.bf16.msra.mxu1 %v1213_v32  ;;  %1120 = vmatprep.mubr.f32.mxu1 %v307_v59 }
  0x1f   : > { %1171 = vmatprep.mubr.f32.mxu0 %v325_v52  ;;  %1218 = vmatprep.subr.bf16.mxu1 %v1217_v62  ;;  %v357_v8 = vand.u32 4294901760, %v356_v5 }
  0x21   : > { %1121 = vmatmul.mubr.f32.gmra.mrb[2].mxu1 %v317_v63  ;;  %1172 = vmatmul.mubr.f32.gmra.mrb[4].mxu0 %v335_v53 }
  0x22   : > { %1123 = vmatprep.mubr.f32.mxu1 %v327_v2  ;;  %1174 = vmatprep.mubr.f32.mxu0 %v345_v58 }
  0x25   : > { %1124 = vmatmul.mubr.f32.gmra.mrb[4].mxu1 %v337_v7  ;;  %1175 = vmatmul.mubr.f32.gmra.mrb[6].mxu0 %v355_v1 }
  0x26   : > { %1126 = vmatprep.mubr.f32.mxu1 %v347_v6  ;;  %1181 = vmatprep.mubr.f32.mxu0 %v1356_v21 }
  0x29   : > { %1127 = vmatmul.mubr.f32.gmra.mrb[6].mxu1 %v357_v8  ;;  %1182 = vmatmul.mubr.f32.vlgmr.msra.gmra.mrb[0].mxu0 %v1358_v22 }
  0x2a   : > { %1133 = vmatprep.mubr.f32.mxu1 %v1356_v21  ;;  %1184 = vmatprep.mubr.f32.mxu0 %v1360_v26 }
  0x2b   : > { %1232 = vmatpush3.bf16.msra.mxu0 %v1331_v4 }
  0x2d   : > { %1134 = vmatmul.mubr.f32.vlgmr.msra.gmra.mrb[0].mxu1 %v1358_v22  ;;  %1185 = vmatmul.mubr.f32.gmra.mrb[2].mxu0 %v1371_v33 }
  0x2e   : > { %1220 = vmatpush3.bf16.msra.mxu1 %v1217_v62  ;;  %1136 = vmatprep.mubr.f32.mxu1 %v1360_v26 }
  0x2f   : > { %1187 = vmatprep.mubr.f32.mxu0 %v1376_v36 }
  0x31   : > { %1137 = vmatmul.mubr.f32.gmra.mrb[2].mxu1 %v1371_v33  ;;  %1188 = vmatmul.mubr.f32.gmra.mrb[4].mxu0 %v1378_v37 }
  0x32   : > { %1139 = vmatprep.mubr.f32.mxu1 %v1376_v36  ;;  %1190 = vmatprep.mubr.f32.mxu0 %v1386_v42 }
  0x35   : > { %1140 = vmatmul.mubr.f32.gmra.mrb[4].mxu1 %v1378_v37  ;;  %1191 = vmatmul.mubr.f32.gmra.mrb[6].mxu0 %v1405_v54 }
  0x36   : > { %1142 = vmatprep.mubr.f32.mxu1 %v1386_v42  ;;  %1197 = vmatprep.mubr.f32.mxu0 %v1356_v21 }
  0x39   : > { %1143 = vmatmul.mubr.f32.gmra.mrb[6].mxu1 %v1405_v54  ;;  %1198 = vmatmul.mubr.f32.vlgmr.msra.gmra.mrb[0].mxu0 %v1358_v22 }
  0x3a   : > { %1149 = vmatprep.mubr.f32.mxu1 %v1366_v30  ;;  %1200 = vmatprep.mubr.f32.mxu0 %v1360_v26 }
  0x3d   : > { %1150 = vmatmul.mubr.f32.vlgmr.msra.gmra.mrb[0].mxu1 %v1369_v31  ;;  %1201 = vmatmul.mubr.f32.gmra.mrb[2].mxu0 %v1371_v33 }
  0x3e   : > { %1152 = vmatprep.mubr.f32.mxu1 %v1374_v35  ;;  %1203 = vmatprep.mubr.f32.mxu0 %v1376_v36 }
  0x41   : > { %1153 = vmatmul.mubr.f32.gmra.mrb[2].mxu1 %v1384_v41  ;;  %1204 = vmatmul.mubr.f32.gmra.mrb[4].mxu0 %v1378_v37 }
  0x42   : > { %1155 = vmatprep.mubr.f32.mxu1 %v1390_v44  ;;  %1206 = vmatprep.mubr.f32.mxu0 %v1386_v42 }
  0x45   : > { %1156 = vmatmul.mubr.f32.gmra.mrb[4].mxu1 %v1393_v45  ;;  %1207 = vmatmul.mubr.f32.gmra.mrb[6].mxu0 %v1405_v54 }
  0x46   : > { %1158 = vmatprep.mubr.f32.mxu1 %v1400_v50 }
  0x49   : > { %1159 = vmatmul.mubr.f32.gmra.mrb[6].mxu1 %v354_v61 }
 0x10c   : > { %v1199_v4 = vpop.f32.mrb[0].mxu0 }
 0x10d   : > { %v930_v9 = vpop.f32.mrb[1].mxu0 }
 0x110   : > { %v1151_v11 = vpop.f32.mrb[0].mxu1  ;;  %v1202_v12 = vpop.f32.mrb[2].mxu0 }
 0x111   : > { %v1233_v13 = vadd.f32 %v1151_v11, %v1050_v10  ;;  %v558_v14 = vpop.f32.mrb[1].mxu1  ;;  %v942_v15 = vpop.f32.mrb[3].mxu0 }
 0x112   : > { %v1235_v16 = vadd.f32 %v1050_v10, %v558_v14 }
 0x113   : > { %v1234_v17 = vadd.f32 %v1233_v13, %v1199_v4 }
 0x114   : > { %v1236_v18 = vadd.f32 %v1235_v16, %v930_v9  ;;  %v1154_v19 = vpop.f32.mrb[2].mxu1  ;;  %v1205_v20 = vpop.f32.mrb[4].mxu0 }
 0x115   : > { %978 = vst.msk [vmem:[%s1456_s27 + $0x8] sm:$0xff] %vm976_vm1, %v1234_v17  ;;  %v1237_v21 = vadd.f32 %v1154_v19, %v1050_v10  ;;  %v572_v22 = vpop.f32.mrb[3].mxu1  ;;  %v954_v23 = vpop.f32.mrb[5].mxu0 }
 0x116   : > { %977 = vst.msk [vmem:[%s1456_s27] sm:$0xff] %vm976_vm1, %v1236_v18  ;;  %v1239_v24 = vadd.f32 %v1050_v10, %v572_v22 }
 0x117   : > { %v1238_v25 = vadd.f32 %v1237_v21, %v1202_v12 }
 0x118   : > { %v1240_v26 = vadd.f32 %v1239_v24, %v942_v15  ;;  %v1157_v27 = vpop.f32.mrb[4].mxu1  ;;  %v1208_v28 = vpop.f32.mrb[6].mxu0 }
 0x119   : > { %980 = vst.msk [vmem:[%s1456_s27 + $0x18] sm:$0xff] %vm976_vm1, %v1238_v25  ;;  %v1241_v29 = vadd.f32 %v1157_v27, %v1050_v10  ;;  %v586_v30 = vpop.f32.mrb[5].mxu1  ;;  %v966_v31 = vpop.f32.mrb[7].mxu0 }
 0x11a   : > { %979 = vst.msk [vmem:[%s1456_s27 + $0x10] sm:$0xff] %vm976_vm1, %v1240_v26  ;;  %v1243_v32 = vadd.f32 %v1050_v10, %v586_v30 }
 0x11b   : > { %v1242_v33 = vadd.f32 %v1241_v29, %v1205_v20 }
 0x11c   : > { %v1244_v34 = vadd.f32 %v1243_v32, %v954_v23  ;;  %v1160_v35 = vpop.f32.mrb[6].mxu1 }
 0x11d   : > { %982 = vst.msk [vmem:[%s1456_s27 + $0x28] sm:$0xff] %vm976_vm1, %v1242_v33  ;;  %v1245_v36 = vadd.f32 %v1160_v35, %v1050_v10  ;;  %v600_v37 = vpop.f32.mrb[7].mxu1 }
 0x11e   : > { %981 = vst.msk [vmem:[%s1456_s27 + $0x20] sm:$0xff] %vm976_vm1, %v1244_v34  ;;  %v1247_v38 = vadd.f32 %v1050_v10, %v600_v37 }
 0x11f   : > { %v1246_v39 = vadd.f32 %v1245_v36, %v1208_v28 }
 0x120   : > { %v1248_v40 = vadd.f32 %v1247_v38, %v966_v31 }
 0x121   : > { %984 = vst.msk [vmem:[%s1456_s27 + $0x38] sm:$0xff] %vm976_vm1, %v1246_v39 }
 0x122   : > { %983 = vst.msk [vmem:[%s1456_s27 + $0x30] sm:$0xff] %vm976_vm1, %v1248_v40 }
 0x123 PF: > { %s13_s12 = sadd.s32 1, %s1295_s12  }
 0x124   : > { %p10_p4 = scmp.ge.s32.totalorder %s13_s12, 4  }
 0x126   :  { %12 = sbr.rel (!%p10_p4) target bundleno = 1 (0x1), region = 62 }

</bundles_post_ra>
